<compile_context>
chip_gen: v6e
topology: v6e:2x2x1
jax: 0.10.0
libtpu: 0.0.40
codegen_flags: <defaults>
</compile_context>

<pallas_src>
import numpy as np
import jax
import jax.numpy as jnp
from jax.experimental import pallas as pl
from jax.experimental.pallas import tpu as pltpu


def _round_up(v, m):
    return ((v + m - 1) // m) * m


# ----------------------------------------------------------------------------
# Pallas kernel: predictor MLP + folded log_softmax loss (per-tile partial sums)
# ----------------------------------------------------------------------------
def attr_head_kernel(xc_ref, w1_ref, b1_ref, w2_ref, b2_ref, t_ref,
                     logits_ref, loss_ref):
    # FC1 (feature||embedding concat already fused in the wrapper; K padded to 128)
    h = jnp.dot(xc_ref[...], w1_ref[...], preferred_element_type=jnp.float32)
    h = jnp.maximum(h + b1_ref[...].astype(jnp.float32), 0.0)

    # FC2 -> attribute logits (fp32 accumulation; feed MXU in the weights' dtype)
    logits = jnp.dot(h.astype(w2_ref.dtype), w2_ref[...],
                     preferred_element_type=jnp.float32)
    logits = logits + b2_ref[...].astype(jnp.float32)
    logits_ref[...] = logits.astype(logits_ref.dtype)

    # log_softmax folded into the loss (all fp32):
    #   sum(-0.5 * t * logprobs) = -0.5 * ( sum(t * shifted) - lse * sum(t) )
    m = jnp.max(logits, axis=1, keepdims=True)
    shifted = logits - m
    lse = jnp.log(jnp.sum(jnp.exp(shifted), axis=1, keepdims=True))

    t = t_ref[...].astype(jnp.float32)
    t_sum = jnp.sum(t, axis=1, keepdims=True)               # (tm, 1)
    ts_sum = jnp.sum(t * shifted, axis=1, keepdims=True)    # (tm, 1)
    row_loss = -0.5 * (ts_sum - lse * t_sum)                # (tm, 1)  (pad rows -> 0)

    # Per-tile partial sum, broadcast to an (8,128) block for a lane-dense store.
    tile_loss = jnp.sum(row_loss, axis=0, keepdims=True)    # (1, 1)
    loss_ref[...] = jnp.broadcast_to(tile_loss, loss_ref.shape)


# ----------------------------------------------------------------------------
# Wrapper: concat/padding, tile selection, BlockSpecs, grid, final reduction
# ----------------------------------------------------------------------------
def attr_predictor_and_loss(x, emb, w1, b1, w2, b2, attr_t, n_valid,
                            *, tm=None, logits_dtype=None):
    """x: [P, Df] pooled ROI features, emb: [P, De] class embeddings,
    w1: [Df+De, H], b1: [1, H], w2: [H, A], b2: [1, A], attr_t: [P, A].
    Returns (attr_logits [P, A], scalar loss)."""
    P, Df = x.shape
    De = emb.shape[1]
    K = Df + De
    H = w1.shape[1]
    A = w2.shape[1]
    assert w1.shape[0] == K

    logits_dtype = jnp.float32 if logits_dtype is None else logits_dtype

    # ---- row tile: sized from P, not a fixed 128 ----
    row_mult = 16                       # valid sublane multiple for both f32 and bf16
    if tm is None:
        if P <= row_mult:
            tm = row_mult
        else:
            # aim for >= 2 grid steps (v7x megacore), cap to amortize step overhead
            tm = min(512, _round_up(pl.cdiv(P, 2), row_mult))
    n_tiles = max(1, pl.cdiv(max(P, 1), tm))
    p_pad = n_tiles * tm

    # ---- lane-dense padding of contraction / hidden dims (exact: pads are zero) ----
    Kp = _round_up(K, 128)
    Hp = _round_up(H, 128)

    xc = jnp.concatenate([x, emb], axis=1)                       # [P, K]
    xc = jnp.pad(xc, ((0, p_pad - P), (0, Kp - K)))              # [p_pad, Kp]
    attr_t = jnp.pad(attr_t, ((0, p_pad - P), (0, 0)))           # pad rows -> zero loss
    w1p = jnp.pad(w1, ((0, Kp - K), (0, Hp - H)))
    b1p = jnp.pad(b1, ((0, 0), (0, Hp - H)))
    w2p = jnp.pad(w2, ((0, Hp - H), (0, 0)))

    nbytes = lambda a: int(a.size) * a.dtype.itemsize
    cost = pl.CostEstimate(
        flops=2 * p_pad * (Kp * Hp + Hp * A) + 8 * p_pad * A,
        transcendentals=p_pad * A + p_pad,
        bytes_accessed=(nbytes(xc) + nbytes(attr_t)
                        + nbytes(w1p) + nbytes(b1p) + nbytes(w2p) + nbytes(b2)
                        + p_pad * A * jnp.dtype(logits_dtype).itemsize
                        + n_tiles * 8 * 128 * 4),
    )

    logits, tile_loss = pl.pallas_call(
        attr_head_kernel,
        out_shape=(
            jax.ShapeDtypeStruct((p_pad, A), logits_dtype),          # attr_logits
            jax.ShapeDtypeStruct((n_tiles * 8, 128), jnp.float32),   # per-tile loss partials
        ),
        grid_spec=pltpu.PrefetchScalarGridSpec(
            num_scalar_prefetch=0,
            grid=(n_tiles,),
            in_specs=[
                pl.BlockSpec((tm, Kp), lambda i: (i, 0)),   # xc (x||emb, row tile)
                pl.BlockSpec((Kp, Hp), lambda i: (0, 0)),   # W1 (resident)
                pl.BlockSpec((1, Hp), lambda i: (0, 0)),    # b1
                pl.BlockSpec((Hp, A), lambda i: (0, 0)),    # W2 (resident)
                pl.BlockSpec((1, A), lambda i: (0, 0)),     # b2
                pl.BlockSpec((tm, A), lambda i: (i, 0)),    # attr targets (row tile)
            ],
            out_specs=[
                pl.BlockSpec((tm, A), lambda i: (i, 0)),    # attr_logits
                pl.BlockSpec((8, 128), lambda i: (i, 0)),   # per-tile loss partial
            ],
        ),
        compiler_params=pltpu.CompilerParams(
            dimension_semantics=("parallel",)),             # no cross-step dependency
        cost_estimate=cost,
    )(xc, w1p, b1p, w2p, b2, attr_t)

    per_tile = tile_loss.reshape(n_tiles, 8, 128)[:, 0, 0]          # (n_tiles,)
    loss = jnp.sum(per_tile) / jnp.maximum(n_valid, jnp.float32(1.0))   # guard n_valid==0
    return logits[:P], loss


# ----------------------------------------------------------------------------
# Pure-JAX reference for verification
# ----------------------------------------------------------------------------
def reference(xc, w1, b1, w2, b2, attr_t, n_valid):
    h = jnp.maximum(xc @ w1 + b1, 0.0)
    logits = h @ w2 + b2
    logprobs = jax.nn.log_softmax(logits, axis=1)
    loss = jnp.sum(-0.5 * attr_t * logprobs, axis=1)
    return logits, jnp.sum(loss) / jnp.maximum(n_valid, 1.0)


if __name__ == "__main__":
    key = jax.random.PRNGKey(0)
    k_feat, k_lab, k_attr, k_emb, k_w1, k_b1, k_w2, k_b2 = jax.random.split(key, 8)

    # Small, forward-consistent shapes
    NUM_PROPOSALS = 24      # total proposals across images
    FEAT_DIM      = 32      # pooled ROI feature dim
    NUM_CLASSES   = 8       # object classes (label 0 = background)
    EMBED_DIM     = 32      # class embedding dim
    HIDDEN        = 64      # predictor hidden dim
    NUM_ATTRS     = 128     # attribute classes

    # features: [num_proposals, feat_dim] (pooled ROI feature vectors)
    features = jax.random.normal(k_feat, (NUM_PROPOSALS, FEAT_DIM), dtype=jnp.float32)
    # per-proposal object labels (0 = background / negative)
    labels = jax.random.randint(k_lab, (NUM_PROPOSALS,), 0, NUM_CLASSES)

    # ---- keep_only_positive_boxes (host-side glue, eager) ----
    pos_idx = np.nonzero(np.asarray(labels) > 0)[0]
    n_pos = int(pos_idx.shape[0])
    x_pos = features[pos_idx]                 # [n_pos, FEAT_DIM]
    obj_targets = labels[pos_idx]             # [n_pos]

    # synthetic multi-hot attribute targets (stand-in for prepare_targets)
    attr_targets = jax.random.bernoulli(
        k_attr, 0.1, (n_pos, NUM_ATTRS)).astype(jnp.float32)
    # bf16 storage for the kernel's target stream (exact for 0/1 labels)
    attr_targets_bf = attr_targets.astype(jnp.bfloat16)

    # ---- deterministic predictor parameters ----
    cls_embed = 0.05 * jax.random.normal(k_emb, (NUM_CLASSES, EMBED_DIM), jnp.float32)
    w1 = 0.05 * jax.random.normal(k_w1, (FEAT_DIM + EMBED_DIM, HIDDEN), jnp.float32)
    b1 = 0.05 * jax.random.normal(k_b1, (1, HIDDEN), jnp.float32)
    w2 = 0.05 * jax.random.normal(k_w2, (HIDDEN, NUM_ATTRS), jnp.float32)
    b2 = 0.05 * jax.random.normal(k_b2, (1, NUM_ATTRS), jnp.float32)

    # embedding lookup (glue)
    emb = jnp.take(cls_embed, obj_targets, axis=0)      # [n_pos, EMBED_DIM]

    # ---- fp32 path + strict verification ----
    logits, loss = attr_predictor_and_loss(
        x_pos, emb, w1, b1, w2, b2, attr_targets_bf, jnp.float32(n_pos))
    jax.block_until_ready((logits, loss))

    xc = jnp.concatenate([x_pos, emb], axis=1)
    ref_logits, ref_loss = reference(xc, w1, b1, w2, b2, attr_targets,
                                     jnp.float32(n_pos))
    assert np.allclose(np.asarray(logits), np.asarray(ref_logits),
                       rtol=1e-5, atol=1e-5)
    assert np.allclose(float(loss), float(ref_loss), rtol=1e-5, atol=1e-6)

    # ---- bf16-storage path (v6e/v7x bandwidth optimization; fp32 compute inside) ----
    bf = jnp.bfloat16
    logits_bf, loss_bf = attr_predictor_and_loss(
        x_pos.astype(bf), emb.astype(bf), w1.astype(bf), b1.astype(bf),
        w2.astype(bf), b2.astype(bf), attr_targets_bf,
        jnp.float32(n_pos), logits_dtype=bf)
    jax.block_until_ready((logits_bf, loss_bf))
    assert np.allclose(np.asarray(logits_bf.astype(jnp.float32)),
                       np.asarray(ref_logits), rtol=5e-2, atol=2e-2)
    assert np.allclose(float(loss_bf), float(ref_loss), rtol=5e-2, atol=5e-2)

    print("KERNEL_OK")
</pallas_src>

<mosaic_0001>
module attributes {stable_mosaic.version = 11 : i64} {
  func.func @attr_head_kernel(%arg0: i32, %arg1: memref<16x128xf32, #tpu.memory_space<vmem>>, %arg2: memref<128x128xf32, #tpu.memory_space<vmem>>, %arg3: memref<1x128xf32, #tpu.memory_space<vmem>>, %arg4: memref<128x128xf32, #tpu.memory_space<vmem>>, %arg5: memref<1x128xf32, #tpu.memory_space<vmem>>, %arg6: memref<16x128xbf16, #tpu.memory_space<vmem>>, %arg7: memref<16x128xf32, #tpu.memory_space<vmem>>, %arg8: memref<8x128xf32, #tpu.memory_space<vmem>>) attributes {dimension_semantics = [#tpu.dimension_semantics<parallel>], iteration_bounds = array<i64: 2>, scalar_prefetch = 0 : i64, scratch_operands = 0 : i64, tpu.core_type = #tpu.core_type<tc>, window_params = [{transform_indices = @transform_0, window_bounds = array<i64: 16, 128>}, {pipeline_mode = #tpu.pipeline_mode<synchronous>, transform_indices = @transform_1, window_bounds = array<i64: 128, 128>}, {pipeline_mode = #tpu.pipeline_mode<synchronous>, transform_indices = @transform_2, window_bounds = array<i64: 1, 128>}, {pipeline_mode = #tpu.pipeline_mode<synchronous>, transform_indices = @transform_3, window_bounds = array<i64: 128, 128>}, {pipeline_mode = #tpu.pipeline_mode<synchronous>, transform_indices = @transform_4, window_bounds = array<i64: 1, 128>}, {transform_indices = @transform_5, window_bounds = array<i64: 16, 128>}, {transform_indices = @transform_6, window_bounds = array<i64: 16, 128>}, {transform_indices = @transform_7, window_bounds = array<i64: 8, 128>}]} {
    %c0 = arith.constant 0 : index
    %c0_0 = arith.constant 0 : index
    %0 = vector.load %arg1[%c0, %c0_0] : memref<16x128xf32, #tpu.memory_space<vmem>>, vector<16x128xf32>
    %c0_1 = arith.constant 0 : index
    %c0_2 = arith.constant 0 : index
    %1 = vector.load %arg2[%c0_1, %c0_2] : memref<128x128xf32, #tpu.memory_space<vmem>>, vector<128x128xf32>
    %cst = arith.constant dense<0.000000e+00> : vector<16x128xf32>
    %2 = tpu.matmul %0, %1, %cst {dimension_numbers = #tpu.dot_dimension_numbers<[1], [0], [0], [1], [0, 0, 1, 1], [], []>} : vector<16x128xf32>, vector<128x128xf32>, vector<16x128xf32> -> vector<16x128xf32>
    %c0_3 = arith.constant 0 : index
    %c0_4 = arith.constant 0 : index
    %3 = vector.load %arg3[%c0_3, %c0_4] : memref<1x128xf32, #tpu.memory_space<vmem>>, vector<1x128xf32>
    %4 = vector.broadcast %3 : vector<1x128xf32> to vector<16x128xf32>
    %5 = arith.addf %2, %4 : vector<16x128xf32>
    %cst_5 = arith.constant 0.000000e+00 : f32
    %6 = vector.broadcast %cst_5 : f32 to vector<16x128xf32>
    %7 = arith.maximumf %5, %6 : vector<16x128xf32>
    %c0_6 = arith.constant 0 : index
    %c0_7 = arith.constant 0 : index
    %8 = vector.load %arg4[%c0_6, %c0_7] : memref<128x128xf32, #tpu.memory_space<vmem>>, vector<128x128xf32>
    %cst_8 = arith.constant dense<0.000000e+00> : vector<16x128xf32>
    %9 = tpu.matmul %7, %8, %cst_8 {dimension_numbers = #tpu.dot_dimension_numbers<[1], [0], [0], [1], [0, 0, 1, 1], [], []>} : vector<16x128xf32>, vector<128x128xf32>, vector<16x128xf32> -> vector<16x128xf32>
    %c0_9 = arith.constant 0 : index
    %c0_10 = arith.constant 0 : index
    %10 = vector.load %arg5[%c0_9, %c0_10] : memref<1x128xf32, #tpu.memory_space<vmem>>, vector<1x128xf32>
    %11 = vector.broadcast %10 : vector<1x128xf32> to vector<16x128xf32>
    %12 = arith.addf %9, %11 : vector<16x128xf32>
    %c0_11 = arith.constant 0 : index
    %c0_12 = arith.constant 0 : index
    %13 = vector.load %arg7[%c0_11, %c0_12] : memref<16x128xf32, #tpu.memory_space<vmem>>, vector<16x128xf32>
    tpu.vector_store %arg7[%c0_11, %c0_12], %12 {strides = array<i32>} : memref<16x128xf32, #tpu.memory_space<vmem>>, vector<16x128xf32>,
    %cst_13 = arith.constant dense<0xFF800000> : vector<16xf32>
    %14 = vector.multi_reduction <maximumf>, %12, %cst_13 [1] : vector<16x128xf32> to vector<16xf32>
    %15 = vector.shape_cast %14 : vector<16xf32> to vector<16x1xf32>
    %16 = vector.broadcast %15 : vector<16x1xf32> to vector<16x128xf32>
    %17 = arith.subf %12, %16 : vector<16x128xf32>
    %18 = math.exp %17 : vector<16x128xf32>
    %cst_14 = arith.constant dense<0.000000e+00> : vector<16xf32>
    %19 = vector.multi_reduction <add>, %18, %cst_14 [1] : vector<16x128xf32> to vector<16xf32>
    %20 = vector.shape_cast %19 : vector<16xf32> to vector<16x1xf32>
    %21 = math.log %20 : vector<16x1xf32>
    %c0_15 = arith.constant 0 : index
    %c0_16 = arith.constant 0 : index
    %22 = vector.load %arg6[%c0_15, %c0_16] : memref<16x128xbf16, #tpu.memory_space<vmem>>, vector<16x128xbf16>
    %23 = arith.extf %22 : vector<16x128xbf16> to vector<16x128xf32>
    %cst_17 = arith.constant dense<0.000000e+00> : vector<16xf32>
    %24 = vector.multi_reduction <add>, %23, %cst_17 [1] : vector<16x128xf32> to vector<16xf32>
    %25 = vector.shape_cast %24 : vector<16xf32> to vector<16x1xf32>
    %26 = arith.mulf %23, %17 : vector<16x128xf32>
    %cst_18 = arith.constant dense<0.000000e+00> : vector<16xf32>
    %27 = vector.multi_reduction <add>, %26, %cst_18 [1] : vector<16x128xf32> to vector<16xf32>
    %28 = vector.shape_cast %27 : vector<16xf32> to vector<16x1xf32>
    %29 = arith.mulf %21, %25 : vector<16x1xf32>
    %30 = arith.subf %28, %29 : vector<16x1xf32>
    %cst_19 = arith.constant -5.000000e-01 : f32
    %31 = vector.broadcast %cst_19 : f32 to vector<16x1xf32>
    %32 = arith.mulf %31, %30 : vector<16x1xf32>
    %cst_20 = arith.constant dense<0.000000e+00> : vector<1xf32>
    %33 = vector.multi_reduction <add>, %32, %cst_20 [0] : vector<16x1xf32> to vector<1xf32>
    %34 = vector.shape_cast %33 : vector<1xf32> to vector<1x1xf32>
    %35 = vector.shape_cast %34 : vector<1x1xf32> to vector<1x1xf32>
    %36 = vector.broadcast %35 : vector<1x1xf32> to vector<8x128xf32>
    %c0_21 = arith.constant 0 : index
    %c0_22 = arith.constant 0 : index
    %37 = vector.load %arg8[%c0_21, %c0_22] : memref<8x128xf32, #tpu.memory_space<vmem>>, vector<8x128xf32>
    tpu.vector_store %arg8[%c0_21, %c0_22], %36 {strides = array<i32>} : memref<8x128xf32, #tpu.memory_space<vmem>>, vector<8x128xf32>,
    return
  }
  func.func @transform_0(%arg0: i32) -> (i32, i32) {
    %c0_i32 = arith.constant 0 : i32
    %c0_i32_0 = arith.constant 0 : i32
    return %arg0, %c0_i32 : i32, i32
  }
  func.func @transform_1(%arg0: i32) -> (i32, i32) {
    %c0_i32 = arith.constant 0 : i32
    %c0_i32_0 = arith.constant 0 : i32
    %c0_i32_1 = arith.constant 0 : i32
    return %c0_i32, %c0_i32_0 : i32, i32
  }
  func.func @transform_2(%arg0: i32) -> (i32, i32) {
    %c0_i32 = arith.constant 0 : i32
    %c0_i32_0 = arith.constant 0 : i32
    %c0_i32_1 = arith.constant 0 : i32
    return %c0_i32, %c0_i32_0 : i32, i32
  }
  func.func @transform_3(%arg0: i32) -> (i32, i32) {
    %c0_i32 = arith.constant 0 : i32
    %c0_i32_0 = arith.constant 0 : i32
    %c0_i32_1 = arith.constant 0 : i32
    return %c0_i32, %c0_i32_0 : i32, i32
  }
  func.func @transform_4(%arg0: i32) -> (i32, i32) {
    %c0_i32 = arith.constant 0 : i32
    %c0_i32_0 = arith.constant 0 : i32
    %c0_i32_1 = arith.constant 0 : i32
    return %c0_i32, %c0_i32_0 : i32, i32
  }
  func.func @transform_5(%arg0: i32) -> (i32, i32) {
    %c0_i32 = arith.constant 0 : i32
    %c0_i32_0 = arith.constant 0 : i32
    return %arg0, %c0_i32 : i32, i32
  }
  func.func @transform_6(%arg0: i32) -> (i32, i32) {
    %c0_i32 = arith.constant 0 : i32
    %c0_i32_0 = arith.constant 0 : i32
    return %arg0, %c0_i32 : i32, i32
  }
  func.func @transform_7(%arg0: i32) -> (i32, i32) {
    %c0_i32 = arith.constant 0 : i32
    %c0_i32_0 = arith.constant 0 : i32
    return %arg0, %c0_i32 : i32, i32
  }
}

</mosaic_0001>

<bundles_post_ra>
// kernel: tpu_custom_call.1
= control target key start
LH: loop header
LB: loop body
LE: loop exit
PB: predicated region body
PF: predicated region fallthrough
CT: control target
= control target key end

     0   :  { %s1594_s0 = inlined_call_operand.hbm [shape: f32[32,128], index: 0, kind: input, shape index: {}]   ;;  %s1595_s1 = inlined_call_operand.hbm [shape: f32[128,128], index: 1, kind: input, shape index: {}]   ;;  %s1596_s2 = inlined_call_operand.vmem [shape: f32[1,128], index: 2, kind: input, shape index: {}]   ;;  %s1597_s3 = inlined_call_operand.hbm [shape: f32[128,128], index: 3, kind: input, shape index: {}]   ;;  %s1598_s4 = inlined_call_operand.vmem [shape: f32[1,128], index: 4, kind: input, shape index: {}]   ;;  %s1599_s5 = inlined_call_operand.hbm [shape: bf16[32,128], index: 5, kind: input, shape index: {}]   ;;  %s1600_s6 = inlined_call_operand.hbm [shape: f32[32,128], index: 6, kind: output, shape index: {0}]   ;;  %s1601_s7 = inlined_call_operand.hbm [shape: f32[16,128], index: 7, kind: output, shape index: {1}]  }
   0x1   :  { %1605 = sst [smem:[#allocation19_spill]] %s1594_s0 }
   0x2   :  { %1606 = sst [smem:[#allocation20_spill]] %s1595_s1 }
   0x3   :  { %1607 = sst [smem:[#allocation21_spill]] %s1597_s3 }
   0x4   :  { %13 = vsyncpa [#allocation3], 0 }
   0x5   :  { %15 = vsyncpa [#allocation3 + $0x1], 0 }
   0x6   :  { %16 = vsyncpa [#allocation6], 0 }
   0x7   :  { %17 = vsyncpa [#allocation9], 0 }
   0x8   :  { %19 = vsyncpa [#allocation9 + $0x1], 0 }
   0x9   :  { %20 = vsyncpa [#allocation4], 0 }
   0xa   :  { %22 = vsyncpa [#allocation4 + $0x1], 0 }
   0xb   :  { %23 = vsyncpa [#allocation12], 0 }
   0xc   :  { %25 = vsyncpa [#allocation12 + $0x1], 0  ;;  %s1302_s24 = smov 0   ;;  %s1304_s25 = smov 0  }
   0xd   :  { %s1306_s26 = smov 0   ;;  %s1308_s27 = smov 0  }
   0xe LB: > { %s1323_s28 = sadd.s32 4294967295, %s1248_s27   ;;  %s807_s29 = sadd.s32 4294967294, %s1248_s27   ;;  %s1248_s27 = sphi %s1308_s27, %s1631_s27   ;;  %s1244_s26 = sphi %s1306_s26, %s1630_s26   ;;  %s1240_s25 = sphi %s1304_s25, %s1629_s25   ;;  %s1236_s24 = sphi %s1302_s24, %s1628_s24  }
   0xf   : > { %s1327_s30 = sadd.s32 1, %s1248_s27   ;;  %s38_s8 = sadd.s32 1, %s1244_s26 }
  0x10   : > { %s35_s9 = ssub.s32 %s1248_s27, %s1327_s30  ;;  %p45_p0 = scmp.ne.s32.totalorder %s1244_s26, %s1240_s25 }
  0x11   : > { %p36_p1 = scmp.eq.s32.totalorder %s35_s9, 0  ;;  %p46_p2 = scmp.eq.s32.totalorder %s1248_s27, 0 }
  0x12   : > { %p51_p3 = scmp.ne.s32.totalorder %s1240_s25, %s1236_s24  ;;  %p1603_p4 = scmp.eq.s32.totalorder %s1323_s28, 0 }
  0x13   : > { %s1339_s10 = scalar_select %p36_p1, %s1244_s26, %s38_s8  }
  0x14   : > { %p1341_p5 = por %p46_p2, %p45_p0  ;;  %p1347_p6 = por %p1603_p4, %p51_p3 }
  0x15   : > { %1608 = sst [smem:[#allocation18_spill]] %s1339_s10  ;;  %p185_p7 = scmp.eq.s32.totalorder %s1323_s28, 1 }
  0x16   : > { %s1610_s12 = scalar_select %p1347_p6, 1, 0 }
  0x17   : > { %p191_p8 = scmp.eq.s32.totalorder %s807_s29, 1  ;;  %p808_p9 = scmp.ge.s32.totalorder %s1248_s27, 1 }
  0x18   : > { %p224_p10 = scmp.lt.s32.totalorder %s1248_s27, 3  ;;  %p1354_p11 = por %p185_p7, %p45_p0 }
  0x19   : > { %p1358_p12 = por %p191_p8, %p51_p3  ;;  %s1250_s16 = smov [#allocation5]  }
  0x1a   : > { %s1611_s13 = scalar_select %p1354_p11, 1, 0 }
  0x1b   : > { %s1612_s14 = scalar_select %p1358_p12, 1, 0 }
  0x1c   : > { %p1362_p13 = pnand %p808_p9, %p224_p10  ;;  %s236_s17 = sshll.u32 %s1250_s16, 4  ;;  %s237_s17 = int_to_ptr.vmem [resolvable:$true] %s236_s17 }
  0x1d   : > { %p986_p3 = scmp.lt.s32.totalorder %s1248_s27, 2  ;;  %s1251_s19 = smov [#allocation7]  }
  0x1e   : > { %p963_p1 = pneg %p1362_p13  ;;  %s252_s20 = sshll.u32 %s1251_s19, 4  ;;  %s253_s20 = int_to_ptr.vmem [resolvable:$true] %s252_s20 }
  0x1f   : > { %s1049_s21 = scalar_lea.vmem %s237_s17, 2048  ;;  %p1057_p12 = scmp.lt.s32.totalorder %s237_s17, %s237_s17 }
  0x20   : > { %p1370_p2 = pnand %p963_p1, %p1603_p4  ;;  %p1050_p8 = scmp.ne.s32.totalorder %s237_s17, %s1049_s21 }
  0x21   : > { %p1058_p11 = scmp.lt.s32.totalorder %s1049_s21, %s1049_s21 }
  0x22   : > { %p1040_p7 = pneg %p1370_p2 }
  0x23   : > { %p1059_p1 = por %p1058_p11, %p1057_p12 }
  0x24   : > { %p1052_p9 = pnand %p1050_p8, %p1040_p7 }
  0x26   : > { %p1053_p10 = pneg %p1052_p9 }
  0x28   : > { %p1060_p4 = pnand %p1059_p1, %p1053_p10 }
  0x2a   : > { %1063 = shalt.err (!%p1060_p4)
}
  0x2b   : > { %s1252_s22 = smov 128   ;;  %s1253_s23 = smov 8  }
  0x2c   : > { %s1615_s1 = sld [smem:[#allocation20_spill]]  ;;  %s1390_s9 = sand.u32 1, %s1244_s26  }
  0x2d   : > { %s1075_s16 = scalar_lea.vmem %s253_s20, 2048  ;;  %p1083_p8 = scmp.lt.s32.totalorder %s253_s20, %s253_s20 }
  0x2e   : > { %p1076_p11 = scmp.ne.s32.totalorder %s253_s20, %s1075_s16  ;;  %p1084_p9 = scmp.lt.s32.totalorder %s1075_s16, %s1075_s16 }
  0x30   : > { %p1078_p4 = pnand %p1076_p11, %p1040_p7  ;;  %p1085_p10 = por %p1084_p9, %p1083_p8 }
  0x32   : > { %966 = dma.hbm_to_vmem [thread:$0]  (!%p1370_p2), %s1615_s1, 2048, %s237_s17, [#allocation6], %s1252_s22, %s1252_s22, %s1253_s23  }
  0x33   : > { %p1079_p12 = pneg %p1078_p4 }
  0x35   : > { %p1086_p1 = pnand %p1085_p10, %p1079_p12 }
  0x37   : > { %1089 = shalt.err (!%p1086_p1)
}
  0x38   : > { %s1616_s3 = sld [smem:[#allocation21_spill]]  ;;  %s812_s21 = sshll.u32 %s1390_s9, 4 }
  0x39   : > { %s834_s29 = sshll.u32 %s1248_s27, 8  ;;  %s1617_s0 = sld [smem:[#allocation19_spill]] }
  0x3a   : > { %s273_s18 = scalar_lea.vmem [#allocation2], %s812_s21  ;;  %p1416_p7 = pnand %p986_p3, %p1341_p5 }
  0x3b   : > { %s280_s10 = sshll.u32 %s273_s18, 4  ;;  %s1410_s10 = int_to_ptr.vmem [resolvable:$true] %s280_s10 }
  0x3c   : > { %p1092_p11 = pneg %p1416_p7 }
  0x3e   : > { %969 = dma.hbm_to_vmem [thread:$0]  (!%p1370_p2), %s1616_s3, 2048, %s253_s20, [#allocation6], %s1252_s22, %s1252_s22, %s1253_s23  }
  0x3f   : > { %s1408_s1 = scalar_lea.hbm %s1617_s0, %s834_s29  ;;  %s1095_s11 = scalar_lea.hbm %s1617_s0, 512 }
  0x40   : > { %s1090_s8 = scalar_lea.hbm %s1408_s1, 256  ;;  %p1096_p5 = scmp.lt.s32.totalorder %s1408_s1, %s1617_s0 }
  0x41   : > { %p1091_p2 = scmp.ne.s32.totalorder %s1408_s1, %s1090_s8  ;;  %p1097_p3 = scmp.lt.s32.totalorder %s1095_s11, %s1090_s8 }
  0x43   : > { %p1093_p4 = pnand %p1092_p11, %p1091_p2  ;;  %p1098_p8 = por %p1097_p3, %p1096_p5 }
  0x45   : > { %p1094_p12 = pneg %p1093_p4 }
  0x47   : > { %p1099_p9 = pnand %p1098_p8, %p1094_p12 }
  0x49   : > { %1102 = shalt.err (!%p1099_p9)
}
  0x4a   : > { %s1103_s20 = scalar_lea.vmem %s1410_s10, 256  ;;  %s1254_s21 = smov [#allocation2]  }
  0x4b   : > { %p1104_p10 = scmp.ne.s32.totalorder %s1410_s10, %s1103_s20  ;;  %s1108_s29 = sshll.u32 %s1254_s21, 4  ;;  %s1109_s29 = int_to_ptr.vmem [resolvable:$false] %s1108_s29 }
  0x4c   : > { %s1110_s19 = scalar_lea.vmem %s1109_s29, 512  ;;  %p1111_p4 = scmp.lt.s32.totalorder %s1410_s10, %s1109_s29 }
  0x4d   : > { %p1106_p1 = pnand %p1104_p10, %p1092_p11  ;;  %p1112_p0 = scmp.lt.s32.totalorder %s1110_s19, %s1103_s20 }
  0x4f   : > { %p1107_p2 = pneg %p1106_p1  ;;  %p1113_p6 = por %p1112_p0, %p1111_p4 }
  0x51   : > { %p1114_p5 = pnand %p1113_p6, %p1107_p2 }
  0x53   : > { %1117 = shalt.err (!%p1114_p5)
}
  0x54   : > { %s1619_s8 = scalar_lea.sflag [#allocation3], %s1390_s9  ;;  %s835_s11 = sshll.u32 %s1248_s27, 7 }
  0x55   : > { %973 = dma.hbm_to_vmem [thread:$0]  (!%p1416_p7), %s1408_s1, 256, %s1410_s10, %s1619_s8, %s1252_s22, %s1252_s22, %s1253_s23  }
  0x56   : > { %s1620_s16 = sshll.u32 %s1390_s9, 3  ;;  %s1457_s29 = scalar_lea.hbm %s1599_s5, %s835_s11 }
  0x57   : > { %s294_s20 = scalar_lea.vmem [#allocation8], %s1620_s16  ;;  %s291_s0 = scalar_lea.sflag [#allocation9], %s1390_s9 }
  0x58   : > { %s301_s19 = sshll.u32 %s294_s20, 4  ;;  %s1118_s3 = scalar_lea.hbm %s1457_s29, 128  ;;  %s1459_s19 = int_to_ptr.vmem [resolvable:$true] %s301_s19 }
  0x59   : > { %p1119_p6 = scmp.ne.s32.totalorder %s1457_s29, %s1118_s3  ;;  %s1123_s22 = scalar_lea.hbm %s1599_s5, 256 }
  0x5a   : > { %p1124_p3 = scmp.lt.s32.totalorder %s1457_s29, %s1599_s5  ;;  %p1125_p8 = scmp.lt.s32.totalorder %s1123_s22, %s1118_s3 }
  0x5b   : > { %p1121_p0 = pnand %p1119_p6, %p1092_p11 }
  0x5c   : > { %p1126_p9 = por %p1125_p8, %p1124_p3 }
  0x5d   : > { %p1122_p12 = pneg %p1121_p0 }
  0x5f   : > { %p1127_p10 = pnand %p1126_p9, %p1122_p12 }
  0x61   : > { %1130 = shalt.err (!%p1127_p10)
}
  0x62   : > { %s1131_s11 = scalar_lea.vmem %s1459_s19, 128  ;;  %s1255_s16 = smov [#allocation8]  }
  0x63   : > { %p1132_p1 = scmp.ne.s32.totalorder %s1459_s19, %s1131_s11  ;;  %s1136_s20 = sshll.u32 %s1255_s16, 4  ;;  %s1137_s20 = int_to_ptr.vmem [resolvable:$false] %s1136_s20 }
  0x64   : > { %s1138_s18 = scalar_lea.vmem %s1137_s20, 256  ;;  %p1139_p5 = scmp.lt.s32.totalorder %s1459_s19, %s1137_s20 }
  0x65   : > { %p1134_p2 = pnand %p1132_p1, %p1092_p11  ;;  %p1140_p6 = scmp.lt.s32.totalorder %s1138_s18, %s1131_s11 }
  0x67   : > { %p1135_p4 = pneg %p1134_p2  ;;  %p1141_p0 = por %p1140_p6, %p1139_p5 }
  0x69   : > { %p1142_p3 = pnand %p1141_p0, %p1135_p4 }
  0x6b   : > { %1145 = shalt.err (!%p1142_p3)
}
  0x6c   : > { %s1256_s3 = smov 64   ;;  %s1257_s21 = smov 4  }
  0x6d   : > { %976 = dma.hbm_to_vmem [thread:$0]  (!%p1416_p7), %s1457_s29, 128, %s1459_s19, %s291_s0, %s1256_s3, %s1256_s3, %s1257_s21  }
  0x6e   : > { %313 = sbr.rel (%p1362_p13) target bundleno = 899 (0x383), region = 44  ;;  %s1489_s1 = sand.u32 (!%p1362_p13), 1, %s1240_s25  }
  0x6f   : > { %s819_s10 = sshll.u32 (!%p1362_p13), %s1489_s1, 4  ;;  %s316_s22 = scalar_lea.sflag (!%p1362_p13), [#allocation3], %s1489_s1 }
  0x70   : > { %s1495_s23 = scalar_lea.vmem (!%p1362_p13), [#allocation2], %s819_s10  ;;  %p1621_p11 = scmp.ne.s32.totalorder (!%p1362_p13), %s1610_s12, 0 }
  0x73   : > { %1215 = dma.done.wait (%p1621_p11), %s316_s22, 256  }
  0x74   : > { %1217 = vsyncadd (%p1621_p11), %s316_s22, 4294967040  ;;  %p1622_p7 = scmp.eq.s32.totalorder %s1323_s28, 0 }
  0x76   : > { %1219 = dma.done.wait (%p1622_p7), [#allocation6], 4096   ;;  %p1623_p13 = pmov %p1622_p7 }
  0x77   : > { %s822_s0 = sshll.u32 %s1489_s1, 3  ;;  %s333_s15 = scalar_lea.sflag [#allocation9], %s1489_s1 }
  0x78   : > { %1221 = vsyncadd (%p1623_p13), [#allocation6], 4294963200  ;;  %s1509_s9 = scalar_lea.vmem [#allocation8], %s822_s0 }
  0x79   : > { %1223 = dma.done.wait (%p1621_p11), %s333_s15, 128  }
  0x7a   : > { %1225 = vsyncadd (%p1621_p11), %s333_s15, 4294967168  ;;  %v397_v0 = vld [vmem:[#allocation5 + $0x78] sm:$0xff]  ;;  %v396_v1 = vld [vmem:[#allocation5 + $0x70] sm:$0xff]  ;;  %s369_s8 = scalar_lea.vmem [#allocation10], %s819_s10  ;;  %s836_s16 = sshll.u32 %s1323_s28, 8 }
  0x7b   : > { %877 = vmatprep.subr.mxu0 %v397_v0  ;;  %v395_v2 = vld [vmem:[#allocation5 + $0x68] sm:$0xff]  ;;  %v394_v3 = vld [vmem:[#allocation5 + $0x60] sm:$0xff]  ;;  %v393_v5 = vld [vmem:[#allocation5 + $0x58] sm:$0xff]  ;;  %s647_s11 = sshll.u32 %s369_s8, 4  ;;  %s1532_s3 = scalar_lea.hbm %s1600_s6, %s836_s16  ;;  %s1526_s11 = int_to_ptr.vmem [resolvable:$true] %s647_s11 }
  0x7c   : > { %878 = vmatpush3.msra.mxu0 %v397_v0  ;;  %v380_v4 = vld [vmem:[%s1495_s23] sm:$0xff]  ;;  %v497_v6 = vld [vmem:[#allocation7 + $0x78] sm:$0xff]  ;;  %v495_v9 = vld [vmem:[#allocation7 + $0x68] sm:$0xff]  ;;  %s629_s21 = scalar_lea.sflag [#allocation4], %s1489_s1  ;;  %s1146_s10 = scalar_lea.vmem %s1526_s11, 256 }
  0x7d   : > { %879 = vmatprep.subr.mxu0 %v396_v1  ;;  %909 = vmatprep.mubr.f32.mxu0 %v380_v4  ;;  %v496_v7 = vld [vmem:[#allocation7 + $0x70] sm:$0xff]  ;;  %v391_v10 = vld [vmem:[#allocation5 + $0x48] sm:$0xff]  ;;  %v494_v11 = vld [vmem:[#allocation7 + $0x60] sm:$0xff]  ;;  %p1147_p12 = scmp.ne.s32.totalorder %s1526_s11, %s1146_s10  ;;  %p1624_p8 = scmp.ne.s32.totalorder %s1611_s13, 0 }
  0x7e   : > { %880 = vmatpush3.msra.mxu0 %v396_v1  ;;  %912 = vmatprep.subr.mxu1 %v497_v6  ;;  %v392_v8 = vld [vmem:[#allocation5 + $0x50] sm:$0xff]  ;;  %v390_v12 = vld [vmem:[#allocation5 + $0x40] sm:$0xff]  ;;  %v493_v13 = vld [vmem:[#allocation7 + $0x58] sm:$0xff]  ;;  %s1258_s22 = smov [#allocation10]  }
  0x7f   : > { %881 = vmatprep.subr.mxu0 %v395_v2  ;;  %913 = vmatpush3.msra.mxu1 %v497_v6  ;;  %v389_v14 = vld [vmem:[#allocation5 + $0x38] sm:$0xff]  ;;  %v492_v15 = vld [vmem:[#allocation7 + $0x50] sm:$0xff]  ;;  %v491_v17 = vld [vmem:[#allocation7 + $0x48] sm:$0xff]  ;;  %p1148_p9 = pnand %p1147_p12, %p1624_p8 }
  0x80   : > { %882 = vmatpush3.msra.mxu0 %v395_v2  ;;  %914 = vmatprep.subr.mxu1 %v496_v7  ;;  %v388_v16 = vld [vmem:[#allocation5 + $0x30] sm:$0xff]  ;;  %v387_v18 = vld [vmem:[#allocation5 + $0x28] sm:$0xff]  ;;  %v490_v19 = vld [vmem:[#allocation7 + $0x40] sm:$0xff] }
  0x81   : > { %883 = vmatprep.subr.mxu0 %v394_v3  ;;  %915 = vmatpush3.msra.mxu1 %v496_v7  ;;  %v386_v20 = vld [vmem:[#allocation5 + $0x20] sm:$0xff]  ;;  %v489_v21 = vld [vmem:[#allocation7 + $0x38] sm:$0xff]  ;;  %v488_v23 = vld [vmem:[#allocation7 + $0x30] sm:$0xff]  ;;  %p1149_p10 = pneg %p1148_p9 }
  0x82   : > { %884 = vmatpush3.msra.mxu0 %v394_v3  ;;  %916 = vmatprep.subr.mxu1 %v495_v9  ;;  %v385_v22 = vld [vmem:[#allocation5 + $0x18] sm:$0xff]  ;;  %v384_v24 = vld [vmem:[#allocation5 + $0x10] sm:$0xff]  ;;  %v487_v25 = vld [vmem:[#allocation7 + $0x28] sm:$0xff] }
  0x83   : > { %885 = vmatprep.subr.mxu0 %v393_v5  ;;  %917 = vmatpush3.msra.mxu1 %v495_v9  ;;  %v383_v26 = vld [vmem:[#allocation5 + $0x8] sm:$0xff]  ;;  %v486_v27 = vld [vmem:[#allocation7 + $0x20] sm:$0xff]  ;;  %v485_v30 = vld [vmem:[#allocation7 + $0x18] sm:$0xff] }
  0x84   : > { %886 = vmatpush3.msra.mxu0 %v393_v5  ;;  %918 = vmatprep.subr.mxu1 %v494_v11  ;;  %v382_v28 = vld [vmem:[#allocation5] sm:$0xff]  ;;  %v381_v29 = vld [vmem:[%s1495_s23 + $0x8] sm:$0xff]  ;;  %v484_v31 = vld [vmem:[#allocation7 + $0x10] sm:$0xff]  ;;  %s1150_s23 = sshll.u32 %s1258_s22, 4  ;;  %s1151_s23 = int_to_ptr.vmem [resolvable:$false] %s1150_s23 }
  0x85   : > { %887 = vmatprep.subr.mxu0 %v392_v8  ;;  %919 = vmatpush3.msra.mxu1 %v494_v11  ;;  %v483_v32 = vld [vmem:[#allocation7 + $0x8] sm:$0xff]  ;;  %v482_v33 = vld [vmem:[#allocation7] sm:$0xff]  ;;  %s1152_s15 = scalar_lea.vmem %s1151_s23, 512  ;;  %p1153_p1 = scmp.lt.s32.totalorder %s1526_s11, %s1151_s23 }
  0x86   : > { %888 = vmatpush3.msra.mxu0 %v392_v8  ;;  %920 = vmatprep.subr.mxu1 %v493_v13  ;;  %v825_v34 = vld [vmem:[%s1596_s2] ss:$0 sm:$0xff]  ;;  %p1154_p2 = scmp.lt.s32.totalorder %s1152_s15, %s1146_s10 }
  0x87   : > { %889 = vmatprep.subr.mxu0 %v391_v10  ;;  %921 = vmatpush3.msra.mxu1 %v493_v13  ;;  %v826_v41 = vld [vmem:[%s1598_s4] ss:$0 sm:$0xff] }
  0x88   : > { %890 = vmatpush3.msra.mxu0 %v391_v10  ;;  %922 = vmatprep.subr.mxu1 %v492_v15  ;;  %v838_v46 = vld [vmem:[%s1509_s9] sm:$0xff]   ;;  %p1155_p4 = por %p1154_p2, %p1153_p1 }
  0x89   : > { %891 = vmatprep.subr.mxu0 %v390_v12  ;;  %923 = vmatpush3.msra.mxu1 %v492_v15  ;;  %v839_v47 = vunpack.c.l.bf16 %v838_v46  ;;  %v840_v57 = vunpack.c.h.bf16 %v838_v46 }
  0x8a   : > { %892 = vmatpush3.msra.mxu0 %v390_v12  ;;  %924 = vmatprep.subr.mxu1 %v491_v17  ;;  %p1156_p5 = pnand %p1155_p4, %p1149_p10 }
  0x8b   : > { %893 = vmatprep.subr.mxu0 %v389_v14  ;;  %925 = vmatpush3.msra.mxu1 %v491_v17 }
  0x8c   : > { %894 = vmatpush3.msra.mxu0 %v389_v14  ;;  %926 = vmatprep.subr.mxu1 %v490_v19 }
  0x8d   : > { %895 = vmatprep.subr.mxu0 %v388_v16  ;;  %927 = vmatpush3.msra.mxu1 %v490_v19 }
  0x8e   : > { %896 = vmatpush3.msra.mxu0 %v388_v16  ;;  %928 = vmatprep.subr.mxu1 %v489_v21 }
  0x8f   : > { %897 = vmatprep.subr.mxu0 %v387_v18  ;;  %929 = vmatpush3.msra.mxu1 %v489_v21 }
  0x90   : > { %898 = vmatpush3.msra.mxu0 %v387_v18  ;;  %930 = vmatprep.subr.mxu1 %v488_v23 }
  0x91   : > { %899 = vmatprep.subr.mxu0 %v386_v20  ;;  %931 = vmatpush3.msra.mxu1 %v488_v23 }
  0x92   : > { %900 = vmatpush3.msra.mxu0 %v386_v20  ;;  %932 = vmatprep.subr.mxu1 %v487_v25 }
  0x93   : > { %901 = vmatprep.subr.mxu0 %v385_v22  ;;  %933 = vmatpush3.msra.mxu1 %v487_v25 }
  0x94   : > { %902 = vmatpush3.msra.mxu0 %v385_v22  ;;  %934 = vmatprep.subr.mxu1 %v486_v27 }
  0x95   : > { %903 = vmatprep.subr.mxu0 %v384_v24  ;;  %935 = vmatpush3.msra.mxu1 %v486_v27 }
  0x96   : > { %904 = vmatpush3.msra.mxu0 %v384_v24  ;;  %936 = vmatprep.subr.mxu1 %v485_v30 }
  0x97   : > { %905 = vmatprep.subr.mxu0 %v383_v26  ;;  %937 = vmatpush3.msra.mxu1 %v485_v30 }
  0x98   : > { %906 = vmatpush3.msra.mxu0 %v383_v26  ;;  %938 = vmatprep.subr.mxu1 %v484_v31 }
  0x99   : > { %907 = vmatprep.subr.mxu0 %v382_v28  ;;  %939 = vmatpush3.msra.mxu1 %v484_v31 }
  0x9a   : > { %908 = vmatpush3.msra.mxu0 %v382_v28  ;;  %940 = vmatprep.subr.mxu1 %v483_v32 }
  0x9b   : > { %910 = vmatmul.mubr.f32.vlgmr.msra.gmra.mxu0 %v381_v29  ;;  %941 = vmatpush3.msra.mxu1 %v483_v32 }
  0x9c   : > { %942 = vmatprep.subr.mxu1 %v482_v33 }
  0x9d   : > { %943 = vmatpush3.msra.mxu1 %v482_v33 }
 0x15b   : > { %v911_v35 = vpop.f32.mrf.mxu0 }
 0x15c   : > { %v477_v36 = vadd.f32 %v911_v35, %v825_v34 }
 0x15d   : > { %v471_v37 = vpop.f32.mrf.mxu0 }
 0x15e   : > { %v472_v38 = vadd.f32 %v825_v34, %v471_v37  ;;  %v481_v40 = vmax.f32 %v477_v36, 0.0 }
 0x160   : > { %v480_v39 = vmax.f32 %v472_v38, 0.0 }
 0x162   : > { %944 = vmatprep.mubr.f32.mxu1 %v480_v39 }
 0x163   : > { %945 = vmatmul.mubr.f32.vlgmr.msra.gmra.mxu1 %v481_v40 }
 0x223   : > { %v946_v42 = vpop.f32.mrf.mxu1 }
 0x224   : > { %v577_v43 = vadd.f32 %v946_v42, %v826_v41 }
 0x225   : > { %v571_v44 = vpop.f32.mrf.mxu1 }
 0x226   : > { %581 = vst [vmem:[%s369_s8 + $0x8] sm:$0xff] %v577_v43  ;;  %v572_v45 = vadd.f32 %v826_v41, %v571_v44 }
 0x228   : > { %580 = vst [vmem:[%s369_s8] sm:$0xff] %v572_v45  ;;  %582 = vmax.xlane.f32.xlu0 %v572_v45 }
 0x22c   : > { %584 = vmax.xlane.f32.xlu0 %v577_v43 }
 0x230   : > { %604 = vadd.xlane.f32.xlu0 %v839_v47 }
 0x2b1   : > { %v583_v48 = vpop.xlane.xlu0 %582 }
 0x2b2   : > { %v586_v49 = vsub.f32 %v572_v45, %v583_v48 }
 0x2b4   : > { %v588_v50 = vmul.f32 1.442695, %v586_v49  ;;  %v608_v51 = vmul.f32 %v839_v47, %v586_v49 }
 0x2b5   : > { %v585_v52 = vpop.xlane.xlu0 %584 }
 0x2b6   : > { %v587_v53 = vsub.f32 %v577_v43, %v585_v52  ;;  %610 = vadd.xlane.f32.xlu0 %v608_v51  ;;  %1030 = vpow2.f32 %v588_v50 }
 0x2b8   : > { %v590_v54 = vmul.f32 1.442695, %v587_v53  ;;  %v609_v58 = vmul.f32 %v840_v57, %v587_v53 }
 0x2ba   : > { %1032 = vpow2.f32 %v590_v54 }
 0x2c3   : > { %v1031_v55 = vpop.eup %1030 }
 0x2c4   : > { %592 = vadd.xlane.f32.xlu1 %v1031_v55 }
 0x2c7   : > { %v1033_v56 = vpop.eup %1032 }
 0x2c8   : > { %594 = vadd.xlane.f32.xlu1 %v1033_v56 }
 0x2cc   : > { %606 = vadd.xlane.f32.xlu1 %v840_v57 }
 0x2d0   : > { %612 = vadd.xlane.f32.xlu1 %v609_v58 }
 0x2d1   : > { %1159 = shalt.err (!%p1156_p5)
}
 0x2d2   : > { %s1160_s9 = scalar_lea.hbm %s1532_s3, 256  ;;  %s1164_s19 = scalar_lea.hbm %s1600_s6, 512 }
 0x2d3   : > { %p1161_p6 = scmp.ne.s32.totalorder %s1532_s3, %s1160_s9  ;;  %p1165_p11 = scmp.lt.s32.totalorder %s1532_s3, %s1600_s6 }
 0x2d4   : > { %p1166_p7 = scmp.lt.s32.totalorder %s1164_s19, %s1160_s9 }
 0x2d5   : > { %p1162_p0 = pnand %p1161_p6, %p1624_p8 }
 0x2d6   : > { %p1167_p13 = por %p1166_p7, %p1165_p11 }
 0x2d7   : > { %p1163_p3 = pneg %p1162_p0 }
 0x2d9   : > { %p1168_p12 = pnand %p1167_p13, %p1163_p3 }
 0x2db   : > { %1171 = shalt.err (!%p1168_p12)
}
 0x2dc   : > { %s1259_s16 = smov 128   ;;  %s1260_s20 = smov 8   ;;  %v605_v62 = vpop.xlane.xlu0 %604 }
 0x2dd   : > { %959 = dma.vmem_to_hbm [thread:$0]  (%p1624_p8), %s1526_s11, 256, %s1532_s3, %s629_s21, %s1259_s16, %s1259_s16, %s1260_s20  }
 0x2de   : > { %s831_s11 = sshll.u32 %s1323_s28, 7  ;;  %s376_s18 = scalar_lea.vmem [#allocation11], %s822_s0 }
 0x2df   : > { %s663_s3 = sshll.u32 %s376_s18, 4  ;;  %s661_s22 = scalar_lea.hbm %s1601_s7, %s831_s11  ;;  %s664_s3 = int_to_ptr.vmem [resolvable:$true] %s663_s3 }
 0x2e0   : > { %s634_s23 = scalar_lea.sflag [#allocation12], %s1489_s1  ;;  %s1172_s15 = scalar_lea.vmem %s664_s3, 128 }
 0x2e1   : > { %p1173_p9 = scmp.ne.s32.totalorder %s664_s3, %s1172_s15  ;;  %s1261_s9 = smov [#allocation11]  }
 0x2e2   : > { %s1176_s12 = sshll.u32 %s1261_s9, 4  ;;  %s1177_s12 = int_to_ptr.vmem [resolvable:$false] %s1176_s12 }
 0x2e3   : > { %p1174_p10 = pnand %p1173_p9, %p1624_p8  ;;  %s1178_s28 = scalar_lea.vmem %s1177_s12, 256 }
 0x2e4   : > { %p1179_p2 = scmp.lt.s32.totalorder %s664_s3, %s1177_s12  ;;  %p1180_p4 = scmp.lt.s32.totalorder %s1178_s28, %s1172_s15 }
 0x2e5   : > { %p1175_p1 = pneg %p1174_p10 }
 0x2e6   : > { %p1181_p5 = por %p1180_p4, %p1179_p2 }
 0x2e8   : > { %p1182_p6 = pnand %p1181_p5, %p1175_p1 }
 0x33f   : > { %v611_v4 = vpop.xlane.xlu0 %610 }
 0x34d   : > { %v593_v59 = vpop.xlane.xlu1 %592 }
 0x34e   : > { %1034 = vlog2.f32 %v593_v59 }
 0x351   : > { %v595_v60 = vpop.xlane.xlu1 %594 }
 0x352   : > { %1036 = vlog2.f32 %v595_v60 }
 0x355   : > { %v607_v0 = vpop.xlane.xlu1 %606 }
 0x359   : > { %v613_v7 = vpop.xlane.xlu1 %612 }
 0x35b   : > { %v1035_v61 = vpop.eup %1034 }
 0x35c   : > { %v597_v63 = vmul.f32 0.6931472, %v1035_v61 }
 0x35e   : > { %v614_v1 = vmul.f32 %v605_v62, %v597_v63 }
 0x35f   : > { %v1037_v2 = vpop.eup %1036 }
 0x360   : > { %v599_v3 = vmul.f32 0.6931472, %v1037_v2  ;;  %v616_v6 = vsub.f32 %v611_v4, %v614_v1 }
 0x362   : > { %v615_v5 = vmul.f32 %v607_v0, %v599_v3  ;;  %v618_v9 = vmul.f32 -0.5, %v616_v6 }
 0x364   : > { %v617_v8 = vsub.f32 %v613_v7, %v615_v5 }
 0x366   : > { %v619_v10 = vmul.f32 -0.5, %v617_v8 }
 0x368   : > { %v620_v11 = vadd.f32 %v619_v10, %v618_v9 }
 0x36a   : > { %v621_v12 = vrot.slane %v620_v11, 4 }
 0x36c   : > { %v622_v13 = vadd.f32 %v621_v12, %v620_v11 }
 0x36e   : > { %v623_v14 = vrot.slane %v622_v13, 2 }
 0x370   : > { %v624_v15 = vadd.f32 %v623_v14, %v622_v13 }
 0x372   : > { %v625_v16 = vrot.slane %v624_v15, 1 }
 0x374   : > { %v626_v17 = vadd.f32 %v625_v16, %v624_v15 }
 0x376   : > { %627 = vst [vmem:[%s376_s18] sm:$0xff] %v626_v17 }
 0x377   : > { %1185 = shalt.err (!%p1182_p6)
}
 0x378   : > { %s1186_s0 = scalar_lea.hbm %s661_s22, 128  ;;  %s1190_s19 = scalar_lea.hbm %s1601_s7, 256 }
 0x379   : > { %p1187_p0 = scmp.ne.s32.totalorder %s661_s22, %s1186_s0  ;;  %p1191_p7 = scmp.lt.s32.totalorder %s661_s22, %s1601_s7 }
 0x37a   : > { %p1192_p13 = scmp.lt.s32.totalorder %s1190_s19, %s1186_s0 }
 0x37b   : > { %p1188_p3 = pnand %p1187_p0, %p1624_p8 }
 0x37c   : > { %p1193_p12 = por %p1192_p13, %p1191_p7 }
 0x37d   : > { %p1189_p11 = pneg %p1188_p3 }
 0x37f   : > { %p1194_p9 = pnand %p1193_p12, %p1189_p11 }
 0x381   : > { %1197 = shalt.err (!%p1194_p9)
}
 0x382   : > { %960 = dma.vmem_to_hbm [thread:$0]  (%p1624_p8), %s664_s3, 128, %s661_s22, %s634_s23  }
 0x383 PF: > { %s675_s16 = sand.u32 1, %s1236_s24   ;;  %p1625_p10 = scmp.ne.s32.totalorder %s1612_s14, 0 }
 0x384   : > { %p1626_p1 = scmp.ge.s32.totalorder %s1248_s27, 2  ;;  %s676_s20 = scalar_lea.sflag [#allocation4], %s675_s16 }
 0x386   : > { %p978_p2 = pnand %p1626_p1, %p1625_p10 }
 0x388   : > { %p979_p4 = pneg %p978_p2 }
 0x38a   : > { %1227 = dma.done.wait (%p979_p4), %s676_s20, 256  }
 0x38b   : > { %1229 = vsyncadd (%p979_p4), %s676_s20, 4294967040  ;;  %s685_s11 = scalar_lea.sflag [#allocation12], %s675_s16 }
 0x38c   : > { %1231 = dma.done.wait (%p979_p4), %s685_s11, 128  }
 0x38d   : > { %1233 = vsyncadd (%p979_p4), %s685_s11, 4294967168  ;;  %s1627_s13 = sld [smem:[#allocation18_spill]]  ;;  %p28_p8 = scmp.ge.s32.totalorder %s1327_s30, 4  }
 0x38e   : > { %s1628_s24 = smov %s1240_s25  ;;  %s1629_s25 = smov %s1244_s26 }
 0x38f   : > { %s1631_s27 = smov %s1327_s30  ;;  %30 = sbr.rel (!%p28_p8) target bundleno = 14 (0xe), region = 127 }
 0x393   : > { %s1630_s26 = smov %s1627_s13 }
 0x394   :  { %690 = vsyncpa [#allocation3], 1 }
 0x395   :  { %692 = vsyncpa [#allocation3 + $0x1], 1 }
 0x396   :  { %693 = vsyncpa [#allocation6], 1 }
 0x397   :  { %694 = vsyncpa [#allocation9], 1 }
 0x398   :  { %696 = vsyncpa [#allocation9 + $0x1], 1 }
 0x399   :  { %697 = vsyncpa [#allocation4], 1 }
 0x39a   :  { %699 = vsyncpa [#allocation4 + $0x1], 1 }
 0x39b   :  { %700 = vsyncpa [#allocation12], 1 }
 0x39c   :  { %702 = vsyncpa [#allocation12 + $0x1], 1 }

</bundles_post_ra>
